<compile_context>
chip_gen: v5e
topology: v5e:2x2
jax: 0.10.0
libtpu: 0.0.40
codegen_flags: <defaults>
</compile_context>

<pallas_src>
import functools

import jax
import jax.numpy as jnp
from jax import lax
from jax.experimental import pallas as pl
from jax.experimental.pallas import tpu as pltpu


def _round_up(x, m):
    return ((x + m - 1) // m) * m


def _cross_cov_kernel(ii_ref, jj_ref, a_ref, b_ref, o_ref, *, t_total, tk, inv_t):
    # ii_ref / jj_ref (SMEM scalar-prefetch) are only consumed by the index_maps.
    # a_ref: (tm, tk)  rows i of Xv      b_ref: (tm, tk)  rows j of Xv
    # o_ref: (tm, tm)  output tile, resident across the k (time) grid axis.
    del ii_ref, jj_ref
    nk = -(-t_total // tk)            # static number of reduction steps
    k = pl.program_id(2)

    a = a_ref[...]
    b = b_ref[...]
    if t_total % tk != 0:
        # Ragged time tail: mask the garbage columns of the last partial block
        # in-kernel instead of jnp.pad-ing the input in HBM.
        col = lax.broadcasted_iota(jnp.int32, (1, tk), 1) + k * tk
        valid = col < t_total
        a = jnp.where(valid, a, jnp.zeros_like(a))
        b = jnp.where(valid, b, jnp.zeros_like(b))

    # 'mt,nt->mn': contract the time axis of both row stripes on the MXU.
    contrib = lax.dot_general(
        a, b,
        dimension_numbers=(((1,), (1,)), ((), ())),
        preferred_element_type=jnp.float32,
    )

    if nk == 1:
        o_ref[...] = contrib * inv_t
    else:
        # Accumulate straight into the resident output tile (no VMEM scratch).
        @pl.when(k == 0)
        def _():
            o_ref[...] = jnp.zeros_like(o_ref)

        o_ref[...] += contrib

        @pl.when(k == nk - 1)
        def _():
            o_ref[...] *= inv_t


def cross_covariance(X, *, block_rows=512, block_k=1024,
                     k_stripe_vmem_bytes=16 * 1024 * 1024):
    """Pallas implementation of CrossCovariance.forward.

    X: (N, F, P, T) real.  Returns (N, F*P, F*P) float32:
        out[n] = (X[n].reshape(F*P, T) @ X[n].reshape(F*P, T).T) / T
    """
    assert X.ndim == 4
    n, f, p, t = X.shape
    fp = f * p

    if X.dtype == jnp.float64 or not jnp.issubdtype(X.dtype, jnp.floating):
        X = X.astype(jnp.float32)     # no f64 MXU path on TPU
    Xv = X.reshape(n, fp, t)          # free reshape: no extra HBM pass
    itemsize = Xv.dtype.itemsize

    # ---- tile sizes ---------------------------------------------------------
    # Row/col tile: full extent when FP fits (no overhang), else a multiple of
    # 128 (lane-dense output stores) with a partial last boundary block.
    block_rows = _round_up(block_rows, 128)
    block_k = _round_up(block_k, 128)
    tm = fp if fp <= block_rows else block_rows
    nb = -(-fp // tm)

    # Time tile: prefer a single reduction step (tk = T) so the A row stripe's
    # block index is independent of k and is NOT re-DMA'd across consecutive j
    # tiles (i-major pair order) -> A read once per row block.  Fall back to
    # block_k chunks when the full stripes would blow the VMEM budget.
    if t <= block_k or 4 * tm * _round_up(t, 128) * itemsize <= k_stripe_vmem_bytes:
        tk = t
    else:
        tk = block_k
    gk = -(-t // tk)

    # ---- symmetry: enumerate upper-triangular (i, j) tile pairs, i-major ----
    pairs = [(i, j) for i in range(nb) for j in range(i, nb)]
    i_idx = jnp.asarray([ij[0] for ij in pairs], dtype=jnp.int32)
    j_idx = jnp.asarray([ij[1] for ij in pairs], dtype=jnp.int32)

    a_spec = pl.BlockSpec((None, tm, tk), lambda b, q, k, ii, jj: (b, ii[q], k))
    b_spec = pl.BlockSpec((None, tm, tk), lambda b, q, k, ii, jj: (b, jj[q], k))
    o_spec = pl.BlockSpec((None, tm, tm), lambda b, q, k, ii, jj: (b, ii[q], jj[q]))

    # VMEM footprint (double-buffered A, B and output tiles); defaults stay at
    # the 32 MiB scoped limit, well under v7x's 64 MiB physical VMEM.
    def _vbuf(rows, cols, isz):
        return _round_up(rows, 8) * _round_up(cols, 128) * isz

    vmem_bytes = 4 * _vbuf(tm, tk, itemsize) + 2 * _vbuf(tm, tm, 4)
    vmem_limit = max(32 * 1024 * 1024, vmem_bytes + 4 * 1024 * 1024)

    kernel = functools.partial(
        _cross_cov_kernel, t_total=t, tk=tk, inv_t=1.0 / float(t))

    out = pl.pallas_call(
        kernel,
        out_shape=jax.ShapeDtypeStruct((n, fp, fp), jnp.float32),
        grid_spec=pltpu.PrefetchScalarGridSpec(
            num_scalar_prefetch=2,
            grid=(n, len(pairs), gk),
            in_specs=[a_spec, b_spec],
            out_specs=o_spec,
        ),
        compiler_params=pltpu.CompilerParams(
            # Batch axis is megacore-parallel (v7x); the tile-pair and k axes
            # stay sequential so the output tile is resident across k and the
            # A stripe is reused across consecutive same-i pairs.
            dimension_semantics=("parallel", "arbitrary", "arbitrary"),
            vmem_limit_bytes=int(vmem_limit),
        ),
    )(i_idx, j_idx, Xv, Xv)

    if nb > 1:
        # Mirror the uncomputed lower-triangular tiles from the computed upper
        # ones: element (r, c) lives in a computed tile iff r//tm <= c//tm.
        r = lax.broadcasted_iota(jnp.int32, (fp, fp), 0)
        c = lax.broadcasted_iota(jnp.int32, (fp, fp), 1)
        upper = (r // tm) <= (c // tm)
        out = jnp.where(upper[None], out, jnp.swapaxes(out, -1, -2))
    return out


def _reference(X):
    n, f, p, t = X.shape
    Xv = X.reshape(n, f * p, t).astype(jnp.float32)
    return jnp.einsum("nct,ndt->ncd", Xv, Xv) / t


def _check(X, **kwargs):
    out = jax.block_until_ready(cross_covariance(X, **kwargs))
    ref = _reference(X)
    assert out.shape == ref.shape, (out.shape, ref.shape)
    if not bool(jnp.allclose(out, ref, atol=5e-4, rtol=5e-4)):
        diff = float(jnp.max(jnp.abs(out - ref)))
        raise AssertionError(f"mismatch vs reference, max |diff| = {diff}")
    return out


if __name__ == "__main__":
    key = jax.random.PRNGKey(0)
    k1, k2 = jax.random.split(key)

    # Module-consistent small shapes: batch=2, freqs=4, sensors=16, times=16.
    X1 = jax.random.normal(k1, (2, 4, 16, 16), dtype=jnp.float32)
    _check(X1)                                   # single tile pair, single k step

    # Multi-tile path with ragged FP/T: exercises the symmetry enumeration,
    # the wrapper mirror, the resident-stripe (tk = T) variant, and the
    # chunked-T variant with in-kernel tail masking and o_ref accumulation.
    X2 = jax.random.normal(k2, (1, 3, 50, 200), dtype=jnp.float32)
    _check(X2, block_rows=128)                                        # tk = T
    _check(X2, block_rows=128, block_k=128, k_stripe_vmem_bytes=0)    # chunked T

    print("KERNEL_OK")
</pallas_src>

<mosaic_0001>
module attributes {stable_mosaic.version = 11 : i64} {
  func.func @_cross_cov_kernel(%arg0: i32, %arg1: i32, %arg2: i32, %arg3: memref<1xi32, #tpu.memory_space<smem>>, %arg4: memref<1xi32, #tpu.memory_space<smem>>, %arg5: memref<1x64x16xf32, #tpu.memory_space<vmem>>, %arg6: memref<1x64x16xf32, #tpu.memory_space<vmem>>, %arg7: memref<1x64x64xf32, #tpu.memory_space<vmem>>) attributes {dimension_semantics = [#tpu.dimension_semantics<parallel>, #tpu.dimension_semantics<arbitrary>, #tpu.dimension_semantics<arbitrary>], iteration_bounds = array<i64: 2, 1, 1>, scalar_prefetch = 2 : i64, scratch_operands = 0 : i64, tpu.core_type = #tpu.core_type<tc>, window_params = [{transform_indices = @transform_0, window_bounds = array<i64: 1, 64, 16>}, {transform_indices = @transform_1, window_bounds = array<i64: 1, 64, 16>}, {transform_indices = @transform_2, window_bounds = array<i64: 1, 64, 64>}]} {
    %c0 = arith.constant 0 : index
    %c0_0 = arith.constant 0 : index
    %c0_1 = arith.constant 0 : index
    %0 = vector.load %arg5[%c0, %c0_0, %c0_1] : memref<1x64x16xf32, #tpu.memory_space<vmem>>, vector<1x64x16xf32>
    %1 = vector.shape_cast %0 : vector<1x64x16xf32> to vector<64x16xf32>
    %c0_2 = arith.constant 0 : index
    %c0_3 = arith.constant 0 : index
    %c0_4 = arith.constant 0 : index
    %2 = vector.load %arg6[%c0_2, %c0_3, %c0_4] : memref<1x64x16xf32, #tpu.memory_space<vmem>>, vector<1x64x16xf32>
    %3 = vector.shape_cast %2 : vector<1x64x16xf32> to vector<64x16xf32>
    %cst = arith.constant dense<0.000000e+00> : vector<64x64xf32>
    %4 = tpu.matmul %1, %3, %cst {dimension_numbers = #tpu.dot_dimension_numbers<[1], [1], [0], [0], [0, 0, 1, 0], [], []>} : vector<64x16xf32>, vector<64x16xf32>, vector<64x64xf32> -> vector<64x64xf32>
    %cst_5 = arith.constant 6.250000e-02 : f32
    %5 = vector.broadcast %cst_5 : f32 to vector<64x64xf32>
    %6 = arith.mulf %4, %5 : vector<64x64xf32>
    %c0_6 = arith.constant 0 : index
    %c0_7 = arith.constant 0 : index
    %c0_8 = arith.constant 0 : index
    %7 = vector.load %arg7[%c0_6, %c0_7, %c0_8] : memref<1x64x64xf32, #tpu.memory_space<vmem>>, vector<1x64x64xf32>
    %8 = vector.shape_cast %7 : vector<1x64x64xf32> to vector<64x64xf32>
    %9 = vector.shape_cast %6 : vector<64x64xf32> to vector<1x64x64xf32>
    tpu.vector_store %arg7[%c0_6, %c0_7, %c0_8], %9 {strides = array<i32>} : memref<1x64x64xf32, #tpu.memory_space<vmem>>, vector<1x64x64xf32>,
    return
  }
  func.func @transform_0(%arg0: i32, %arg1: i32, %arg2: i32, %arg3: memref<1xi32, #tpu.memory_space<smem>>, %arg4: memref<1xi32, #tpu.memory_space<smem>>) -> (i32, i32, i32) {
    %0 = arith.index_cast %arg1 : i32 to index
    %1 = memref.load %arg3[%0] : memref<1xi32, #tpu.memory_space<smem>>
    %c0_i32 = arith.constant 0 : i32
    return %arg0, %1, %arg2 : i32, i32, i32
  }
  func.func @transform_1(%arg0: i32, %arg1: i32, %arg2: i32, %arg3: memref<1xi32, #tpu.memory_space<smem>>, %arg4: memref<1xi32, #tpu.memory_space<smem>>) -> (i32, i32, i32) {
    %0 = arith.index_cast %arg1 : i32 to index
    %1 = memref.load %arg4[%0] : memref<1xi32, #tpu.memory_space<smem>>
    %c0_i32 = arith.constant 0 : i32
    return %arg0, %1, %arg2 : i32, i32, i32
  }
  func.func @transform_2(%arg0: i32, %arg1: i32, %arg2: i32, %arg3: memref<1xi32, #tpu.memory_space<smem>>, %arg4: memref<1xi32, #tpu.memory_space<smem>>) -> (i32, i32, i32) {
    %0 = arith.index_cast %arg1 : i32 to index
    %1 = memref.load %arg3[%0] : memref<1xi32, #tpu.memory_space<smem>>
    %2 = arith.index_cast %arg1 : i32 to index
    %3 = memref.load %arg4[%2] : memref<1xi32, #tpu.memory_space<smem>>
    %c0_i32 = arith.constant 0 : i32
    return %arg0, %1, %3 : i32, i32, i32
  }
}

</mosaic_0001>

<bundles_post_ra>
// kernel: tpu_custom_call.1
= control target key start
LH: loop header
LB: loop body
LE: loop exit
PB: predicated region body
PF: predicated region fallthrough
CT: control target
= control target key end

     0   :  { %s921_s0 = inlined_call_operand.<no memory space> [shape: s32[1], index: 0, kind: input, shape index: {}]   ;;  %s922_s1 = inlined_call_operand.<no memory space> [shape: s32[1], index: 1, kind: input, shape index: {}]   ;;  %s923_s2 = inlined_call_operand.vmem [shape: f32[2,64,16], index: 2, kind: input, shape index: {}]   ;;  %s924_s3 = inlined_call_operand.vmem [shape: f32[2,64,16], index: 3, kind: input, shape index: {}]   ;;  %s925_s4 = inlined_call_operand.hbm [shape: f32[2,64,64], index: 4, kind: output, shape index: {}]  }
   0x1   :  { %9 = sst [smem:[#allocation3]] %s921_s0 }
   0x2   :  { %10 = sst [smem:[#allocation4]] %s922_s1 }
   0x3   :  { %11 = vsyncpa [#allocation6], 0 }
   0x4   :  { %13 = vsyncpa [#allocation6 + $0x1], 0  ;;  %s743_s19 = smov 0   ;;  %s745_s20 = smov 0  }
   0x5   :  { %s747_s21 = smov 0   ;;  %s749_s22 = smov 0  }
   0x6   :  { %s751_s23 = smov 0   ;;  %s753_s24 = smov 0  }
   0x7 LB: > { %s515_s0 = sadd.s32 4294967295, %s708_s24   ;;  %s516_s1 = sadd.s32 4294967294, %s708_s24   ;;  %s708_s24 = sphi %s753_s24, %s19_s24   ;;  %s704_s23 = sphi %s751_s23, %s932_s23   ;;  %s700_s22 = sphi %s749_s22, %s931_s22   ;;  %s696_s21 = sphi %s747_s21, %s930_s21   ;;  %s692_s20 = sphi %s745_s20, %s929_s20   ;;  %s688_s19 = sphi %s743_s19, %s928_s19  }
   0x8   : > { %s38_s25 = sadd.s32 1, %s704_s23  ;;  %s117_s26 = sadd.s32 1, %s696_s21 }
   0x9   : > { %p40_p0 = scmp.ge.s32.totalorder %s38_s25, 2  ;;  %p127_p1 = scmp.ne.s32.totalorder %s696_s21, %s692_s20 }
   0xa   : > { %p128_p2 = scmp.eq.s32.totalorder %s515_s0, 1  ;;  %p133_p3 = scmp.ne.s32.totalorder %s692_s20, %s688_s19 }
   0xb   : > { %s934_s25 = smov (%p40_p0, %s38_s25), 0  ;;  %p134_p4 = scmp.eq.s32.totalorder %s516_s1, 1 }
   0xc   : > { %s110_s27 = ssub.s32 %s704_s23, %s934_s25  ;;  %p785_p5 = por %p128_p2, %p127_p1 }
   0xd   : > { %p789_p6 = por %p134_p4, %p133_p3  ;;  %p115_p7 = scmp.eq.s32.totalorder %s110_s27, 0 }
   0xe   : > { %p519_p8 = scmp.ge.s32.totalorder %s708_s24, 1  ;;  %p188_p9 = scmp.lt.s32.totalorder %s708_s24, 3 }
   0xf   : > { %s796_s30 = scalar_select %p115_p7, %s696_s21, %s117_s26  }
  0x10   : > { %p189_p10 = pnand %p519_p8, %p188_p9 }
  0x11   : > { %p233_p11 = scmp.lt.s32.totalorder (!%p189_p10), %s700_s22, 1  ;;  %s799_s5 = sld [smem:[#allocation4]] (!%p189_p10) }
  0x12   : > { %192 = sbr.rel (%p189_p10) target bundleno = 210 (0xd2), region = 28  ;;  %s231_s14 = sld [smem:[#allocation3]] (!%p189_p10) }
  0x13   : > { %s650_s1 = scalar_lea.hbm (!%p189_p10), %s925_s4, 128 }
  0x17   : > { %s802_s6 = scalar_select %p233_p11, %s700_s22, 1  ;;  %vm280_vm0 = vcmask 130048   ;;  %vm378_vm1 = vcmask 523264  }
  0x18   : > { %s524_s7 = sshll.u32 %s799_s5, 3  ;;  %s826_s15 = sshll.u32 %s231_s14, 3 }
  0x19   : > { %p250_p12 = scmp.lt.s32.totalorder %s524_s7, 7  ;;  %s522_s8 = sshll.u32 %s802_s6, 3 }
  0x1a   : > { %p235_p13 = scmp.lt.s32.totalorder %s826_s15, 7  ;;  %s400_s27 = sadd.s32 %s826_s15, %s799_s5 }
  0x1b   : > { %s936_s7 = smov (!%p250_p12, %s524_s7), 7  ;;  %s228_s6 = sand.u32 1, %s692_s20  }
  0x1c   : > { %s256_s9 = sadd.s32 %s522_s8, %s936_s7  ;;  %s520_s7 = sshll.u32 %s228_s6, 6 }
  0x1d   : > { %s526_s10 = sshll.u32 %s256_s9, 3 }
  0x1e   : > { %s811_s13 = scalar_lea.vmem %s924_s3, %s526_s10  ;;  %s230_s10 = scalar_lea.vmem [#allocation5], %s520_s7 }
  0x1f   : > { %v279_v0 = vld [vmem:[%s811_s13 + $0x38] sm:$0xff]  ;;  %v278_v1 = vld [vmem:[%s811_s13 + $0x30] sm:$0xff]  ;;  %v277_v2 = vld [vmem:[%s811_s13 + $0x28] sm:$0xff]  ;;  %s236_s16 = scalar_select %p235_p13, %s826_s15, 7 }
  0x20   : > { %550 = vmatpush.xpose.msk.msra.mxu2 %vm280_vm0, %v279_v0  ;;  %551 = vmatpush.xpose.msk.msra.mxu3 %vm280_vm0, %v279_v0  ;;  %v276_v3 = vld [vmem:[%s811_s13 + $0x20] sm:$0xff]  ;;  %v275_v4 = vld [vmem:[%s811_s13 + $0x18] sm:$0xff]  ;;  %v274_v5 = vld [vmem:[%s811_s13 + $0x10] sm:$0xff]  ;;  %s388_s15 = scalar_lea.sflag [#allocation6], %s228_s6 }
  0x21   : > { %527 = vmatpush.xpose.msk.msra.mxu0 %vm280_vm0, %v279_v0  ;;  %549 = vmatpush.xpose.msk.msra.mxu1 %vm280_vm0, %v279_v0  ;;  %s241_s17 = sadd.s32 %s522_s8, %s236_s16  ;;  %v273_v6 = vld [vmem:[%s811_s13 + $0x8] sm:$0xff]  ;;  %v272_v7 = vld [vmem:[%s811_s13] sm:$0xff]  ;;  %s545_s8 = sshll.u32 %s700_s22, 3 }
  0x22   : > { %s523_s18 = sshll.u32 %s241_s17, 3  ;;  %s402_s9 = sadd.s32 %s545_s8, %s400_s27 }
  0x23   : > { %s243_s26 = scalar_lea.vmem %s923_s2, %s523_s18  ;;  %s546_s11 = sshll.u32 %s402_s9, 3 }
  0x24   : > { %553 = vmatpush.xpose.msk.msra.mxu2 %vm280_vm0, %v278_v1  ;;  %554 = vmatpush.xpose.msk.msra.mxu3 %vm280_vm0, %v278_v1  ;;  %v268_v8 = vld [vmem:[%s243_s26 + $0x20] sm:$0xff]  ;;  %v270_v9 = vld [vmem:[%s243_s26 + $0x30] sm:$0xff]  ;;  %v269_v12 = vld [vmem:[%s243_s26 + $0x28] sm:$0xff]  ;;  %s404_s12 = scalar_lea.hbm %s925_s4, %s546_s11  ;;  %s405_s13 = sshll.u32 %s230_s10, 4  ;;  %s406_s13 = int_to_ptr.vmem [resolvable:$true] %s405_s13 }
  0x25   : > { %528 = vmatpush.xpose.msk.msra.mxu0 %vm280_vm0, %v278_v1  ;;  %552 = vmatpush.xpose.msk.msra.mxu1 %vm280_vm0, %v278_v1  ;;  %v264_v10 = vld [vmem:[%s243_s26] sm:$0xff]  ;;  %v266_v11 = vld [vmem:[%s243_s26 + $0x10] sm:$0xff]  ;;  %v271_v13 = vld [vmem:[%s243_s26 + $0x38] sm:$0xff]  ;;  %s407_s14 = sshll.u32 %s404_s12, 4  ;;  %s408_s14 = int_to_ptr.hbm [resolvable:$true] %s407_s14 }
  0x26   : > { %v265_v14 = vld [vmem:[%s243_s26 + $0x8] sm:$0xff]  ;;  %v267_v15 = vld [vmem:[%s243_s26 + $0x18] sm:$0xff]  ;;  %s644_s16 = sshra.s32 %s408_s14, 4  ;;  %s645_s16 = int_to_ptr.hbm [resolvable:$true] %s644_s16 }
  0x27   : > { %s646_s17 = scalar_lea.hbm %s645_s16, 64  ;;  %p651_p3 = scmp.lt.s32.totalorder %s645_s16, %s925_s4 }
  0x28   : > { %556 = vmatpush.xpose.msk.msra.mxu2 %vm280_vm0, %v277_v2  ;;  %557 = vmatpush.xpose.msk.msra.mxu3 %vm280_vm0, %v277_v2  ;;  %p647_p0 = scmp.ne.s32.totalorder %s645_s16, %s646_s17  ;;  %p652_p4 = scmp.lt.s32.totalorder %s650_s1, %s646_s17 }
  0x29   : > { %529 = vmatpush.xpose.msk.msra.mxu0 %vm280_vm0, %v277_v2  ;;  %555 = vmatpush.xpose.msk.msra.mxu1 %vm280_vm0, %v277_v2 }
  0x2a   : > { %p648_p1 = pnand %p647_p0, %p785_p5  ;;  %p653_p7 = por %p652_p4, %p651_p3 }
  0x2c   : > { %559 = vmatpush.xpose.msk.msra.mxu2 %vm280_vm0, %v276_v3  ;;  %560 = vmatpush.xpose.msk.msra.mxu3 %vm280_vm0, %v276_v3  ;;  %p649_p2 = pneg %p648_p1 }
  0x2d   : > { %530 = vmatpush.xpose.msk.msra.mxu0 %vm280_vm0, %v276_v3  ;;  %558 = vmatpush.xpose.msk.msra.mxu1 %vm280_vm0, %v276_v3 }
  0x2e   : > { %p654_p8 = pnand %p653_p7, %p649_p2 }
  0x30   : > { %562 = vmatpush.xpose.msk.msra.mxu2 %vm280_vm0, %v275_v4  ;;  %563 = vmatpush.xpose.msk.msra.mxu3 %vm280_vm0, %v275_v4 }
  0x31   : > { %531 = vmatpush.xpose.msk.msra.mxu0 %vm280_vm0, %v275_v4  ;;  %561 = vmatpush.xpose.msk.msra.mxu1 %vm280_vm0, %v275_v4 }
  0x34   : > { %565 = vmatpush.xpose.msk.msra.mxu2 %vm280_vm0, %v274_v5  ;;  %566 = vmatpush.xpose.msk.msra.mxu3 %vm280_vm0, %v274_v5 }
  0x35   : > { %532 = vmatpush.xpose.msk.msra.mxu0 %vm280_vm0, %v274_v5  ;;  %564 = vmatpush.xpose.msk.msra.mxu1 %vm280_vm0, %v274_v5 }
  0x38   : > { %568 = vmatpush.xpose.msk.msra.mxu2 %vm280_vm0, %v273_v6  ;;  %569 = vmatpush.xpose.msk.msra.mxu3 %vm280_vm0, %v273_v6 }
  0x39   : > { %533 = vmatpush.xpose.msk.msra.mxu0 %vm280_vm0, %v273_v6  ;;  %567 = vmatpush.xpose.msk.msra.mxu1 %vm280_vm0, %v273_v6 }
  0x3c   : > { %571 = vmatpush.xpose.msk.msra.mxu2 %vm280_vm0, %v272_v7  ;;  %572 = vmatpush.xpose.msk.msra.mxu3 %vm280_vm0, %v272_v7 }
  0x3d   : > { %534 = vmatpush.xpose.msk.msra.mxu0 %vm280_vm0, %v272_v7  ;;  %570 = vmatpush.xpose.msk.msra.mxu1 %vm280_vm0, %v272_v7 }
  0x3f   : > { %539 = vmatmul.msk.f32.vlgmr.msra.gmra.mxu2 %vm280_vm0, %v268_v8  ;;  %541 = vmatmul.msk.f32.vlgmr.msra.gmra.mxu3 %vm280_vm0, %v270_v9 }
  0x40   : > { %535 = vmatmul.msk.f32.vlgmr.msra.gmra.mxu0 %vm280_vm0, %v264_v10  ;;  %537 = vmatmul.msk.f32.vlgmr.msra.gmra.mxu1 %vm280_vm0, %v266_v11 }
  0x47   : > { %540 = vmatmul.msk.f32.gmra.mxu2 %vm280_vm0, %v269_v12  ;;  %542 = vmatmul.msk.f32.gmra.mxu3 %vm280_vm0, %v271_v13 }
  0x48   : > { %536 = vmatmul.msk.f32.gmra.mxu0 %vm280_vm0, %v265_v14  ;;  %538 = vmatmul.msk.f32.gmra.mxu1 %vm280_vm0, %v267_v15 }
  0xbd   : > { %v346_v16 = vpop.f32.mrf.mxu0  ;;  %v352_v17 = vpop.f32.mrf.mxu1 }
  0xbe   : > { %v370_v18 = vmul.f32 0.0625, %v346_v16  ;;  %v372_v19 = vmul.f32 0.0625, %v352_v17 }
  0xc0   : > { %379 = vst.msk [vmem:[%s230_s10] sm:$0xff] %vm378_vm1, %v370_v18 }
  0xc1   : > { %381 = vst.msk [vmem:[%s230_s10 + $0x10] sm:$0xff] %vm378_vm1, %v372_v19 }
  0xc2   : > { %v358_v20 = vpop.f32.mrf.mxu2  ;;  %v364_v21 = vpop.f32.mrf.mxu3 }
  0xc3   : > { %v374_v22 = vmul.f32 0.0625, %v358_v20  ;;  %v376_v23 = vmul.f32 0.0625, %v364_v21 }
  0xc5   : > { %383 = vst.msk [vmem:[%s230_s10 + $0x20] sm:$0xff] %vm378_vm1, %v374_v22  ;;  %v349_v24 = vpop.f32.mrf.mxu0  ;;  %v355_v25 = vpop.f32.mrf.mxu1 }
  0xc6   : > { %385 = vst.msk [vmem:[%s230_s10 + $0x30] sm:$0xff] %vm378_vm1, %v376_v23  ;;  %v371_v26 = vmul.f32 0.0625, %v349_v24  ;;  %v373_v27 = vmul.f32 0.0625, %v355_v25 }
  0xc8   : > { %380 = vst.msk [vmem:[%s230_s10 + $0x8] sm:$0xff] %vm378_vm1, %v371_v26 }
  0xc9   : > { %382 = vst.msk [vmem:[%s230_s10 + $0x18] sm:$0xff] %vm378_vm1, %v373_v27 }
  0xca   : > { %v361_v28 = vpop.f32.mrf.mxu2  ;;  %v367_v29 = vpop.f32.mrf.mxu3 }
  0xcb   : > { %v375_v30 = vmul.f32 0.0625, %v361_v28  ;;  %v377_v31 = vmul.f32 0.0625, %v367_v29 }
  0xcd   : > { %384 = vst.msk [vmem:[%s230_s10 + $0x28] sm:$0xff] %vm378_vm1, %v375_v30 }
  0xce   : > { %386 = vst.msk [vmem:[%s230_s10 + $0x38] sm:$0xff] %vm378_vm1, %v377_v31 }
  0xcf   : > { %657 = shalt.err (!%p654_p8)
}
  0xd0   : > { %s710_s6 = smov 128   ;;  %s711_s7 = smov 8  }
  0xd1   : > { %573 = dma.vmem_to_hbm [thread:$0]  (%p785_p5), %s406_s13, 1024, %s408_s14, %s388_s15, %s710_s6, %s710_s6, %s711_s7  }
  0xd2 PF: > { %p579_p9 = scmp.ge.s32.totalorder %s708_s24, 2  ;;  %s422_s8 = sand.u32 1, %s688_s19  }
  0xd3   : > { %s423_s9 = scalar_lea.sflag [#allocation6], %s422_s8 }
  0xd4   : > { %p576_p10 = pnand %p579_p9, %p789_p6 }
  0xd6   : > { %p577_p11 = pneg %p576_p10 }
  0xd8   : > { %683 = dma.done.wait (%p577_p11), %s423_s9, 1024  }
  0xd9   : > { %685 = vsyncadd (%p577_p11), %s423_s9, 4294966272  ;;  %s19_s24 = sadd.s32 1, %s708_s24   ;;  %s928_s19 = smov %s692_s20 }
  0xda   : > { %p16_p12 = scmp.ge.s32.totalorder %s19_s24, 4   ;;  %s929_s20 = smov %s696_s21 }
  0xdb   : > { %s930_s21 = smov %s796_s30  ;;  %s931_s22 = smov %s704_s23 }
  0xdc   : > { %s932_s23 = smov %s934_s25  ;;  %18 = sbr.rel (!%p16_p12) target bundleno = 7 (0x7), region = 66 }
  0xe1   :  { %429 = vsyncpa [#allocation6], 1 }
  0xe2   :  { %431 = vsyncpa [#allocation6 + $0x1], 1 }

</bundles_post_ra>
